<compile_context>
chip_gen: v7x
topology: tpu7x:2x2x1
jax: 0.10.0
libtpu: 0.0.40
codegen_flags: <defaults>
</compile_context>

<pallas_src>
import functools

import jax
import jax.numpy as jnp
from jax.experimental import pallas as pl
from jax.experimental.pallas import tpu as pltpu

EPS = 1e-6  # matches torch.nn.functional.pairwise_distance default eps


def contrastive_loss_kernel(f1_ref, f2_ref, lbl_ref, out_ref, *, margin, batch, tile_b):
    # Widen to f32 in-kernel (hidden under the DMA); inputs may be bf16/f32.
    f1 = f1_ref[...].astype(jnp.float32)                      # (TILE_B, D)
    f2 = f2_ref[...].astype(jnp.float32)                      # (TILE_B, D)
    lbl = lbl_ref[...].astype(jnp.float32)                    # (TILE_B, 1)

    diff = f1 - f2 + EPS                                      # torch adds eps to the difference
    sq_dist = jnp.sum(diff * diff, axis=-1, keepdims=True)    # (TILE_B, 1)  XLU lane-reduce
    dist = jnp.sqrt(sq_dist)                                  # narrow column
    hinge = jnp.maximum(margin - dist, 0.0)
    loss = lbl * sq_dist + (1.0 - lbl) * hinge * hinge        # (TILE_B, 1)

    # Mask tail rows of the last (partial) block so unspecified boundary-block
    # contents can never leak into the sum (select blocks NaN/Inf propagation).
    row = pl.program_id(0) * tile_b + jax.lax.broadcasted_iota(jnp.int32, loss.shape, 0)
    masked = jnp.where(row < batch, loss, 0.0)                # (TILE_B, 1)

    # Per-tile partial sum: sublane reduce -> (1, 1), broadcast into the tiny
    # (1, 8, 128) output block (only [0, 0, 0] is read by the wrapper).
    partial = jnp.sum(masked, axis=0, keepdims=True)          # (1, 1)
    out_ref[...] = jnp.broadcast_to(partial, (1, 8, 128))


def _sublane_multiple(dtype):
    # Sublane packing: f32 -> 8 rows, bf16/f16 -> 16, int8/fp8 -> 32.
    return {4: 8, 2: 16, 1: 32}.get(jnp.dtype(dtype).itemsize, 8)


def _vmem_capacity_bytes():
    try:
        info = pltpu.get_tpu_info()
        cap = getattr(info, "vmem_capacity_bytes", None)
        if cap:
            return int(cap)
    except Exception:
        pass
    return 64 * 1024 * 1024  # conservative fallback (v7x per-TC VMEM)


def _vmem_ceiling_bytes():
    # v7x: 64 MiB physical per TC -> keep the scoped limit at 32 MiB.
    # v5e/v6e: 128 MiB physical -> 64 MiB scoped limit is safe and lets tiles grow.
    cap = _vmem_capacity_bytes()
    return 32 * 1024 * 1024 if cap <= 64 * 1024 * 1024 else 64 * 1024 * 1024


def _row_footprint_bytes(feat_dim, feat_itemsize, lbl_itemsize):
    # Conservative per-batch-row VMEM footprint of one pipeline step:
    #   2 features x 2 pipeline buffers in native dtype
    # + label column padded to 128 lanes x 2 buffers
    # + ~3 block-sized f32 temporaries (widened inputs / diff / diff^2)
    # + ~6 live (TILE_B, 1) f32 column temporaries (each padded to 128 lanes)
    return (2 * 2 * feat_dim * feat_itemsize
            + 2 * 128 * lbl_itemsize
            + 3 * feat_dim * 4
            + 6 * 128 * 4)


def _default_tile_b(batch, feat_dim, feat_itemsize, lbl_itemsize):
    ceiling = _vmem_ceiling_bytes()
    budget = (ceiling * 5) // 8          # leave ~1.6x headroom under the scoped limit
    rows = budget // max(_row_footprint_bytes(feat_dim, feat_itemsize, lbl_itemsize), 1)
    rows = max(min(rows, 8192), 32)
    rows = (rows // 32) * 32             # safe sublane multiple for f32/bf16/int8
    if rows >= batch:
        return batch                     # single full-extent block (always layout-legal)
    return rows


def contrastive_loss(feat1, feat2, label, *, margin=1.0, tile_b=None):
    assert feat1.ndim == 2 and feat1.shape == feat2.shape
    B, D = feat1.shape
    lbl_itemsize = jnp.dtype(label.dtype).itemsize
    if tile_b is None:
        tile_b = _default_tile_b(B, D, feat1.dtype.itemsize, lbl_itemsize)
    tile_b = min(tile_b, B)
    required = max(_sublane_multiple(feat1.dtype), _sublane_multiple(label.dtype))
    assert tile_b == B or tile_b % required == 0, (
        f"tile_b must be the full batch or a multiple of {required} for these dtypes")

    # No dtype cast here (would materialize full HBM copies); only a cheap reshape.
    label2d = label.reshape(B, 1)
    num_tiles = pl.cdiv(B, tile_b)
    vmem_limit = _vmem_ceiling_bytes()

    partials = pl.pallas_call(
        functools.partial(contrastive_loss_kernel,
                          margin=float(margin), batch=B, tile_b=tile_b),
        out_shape=jax.ShapeDtypeStruct((num_tiles, 8, 128), jnp.float32),
        grid=(num_tiles,),
        in_specs=[
            pl.BlockSpec((tile_b, D), lambda i: (i, 0)),   # feat1 tile
            pl.BlockSpec((tile_b, D), lambda i: (i, 0)),   # feat2 tile
            pl.BlockSpec((tile_b, 1), lambda i: (i, 0)),   # label column (footprint accounted)
        ],
        out_specs=pl.BlockSpec((1, 8, 128), lambda i: (i, 0, 0)),
        compiler_params=pltpu.CompilerParams(
            dimension_semantics=("parallel",),             # lets both v7x TCs stream rows
            vmem_limit_bytes=vmem_limit,
        ),
    )(feat1, feat2, label2d)

    # Tiny final reduction (num_tiles scalars) done by XLA in the wrapper.
    return jnp.sum(partials[:, 0, 0]) / B


def contrastive_loss_ref(feat1, feat2, label, *, margin=1.0):
    # Pure-JAX reference mirroring the PyTorch module (f32 math).
    diff = feat1.astype(jnp.float32) - feat2.astype(jnp.float32) + EPS
    dist = jnp.sqrt(jnp.sum(diff * diff, axis=-1))
    lbl = label.astype(jnp.float32)
    loss = lbl * dist ** 2 + (1.0 - lbl) * jnp.maximum(margin - dist, 0.0) ** 2
    return jnp.mean(loss)


if __name__ == "__main__":
    key = jax.random.PRNGKey(0)
    k1, k2, k3 = jax.random.split(key, 3)

    # Case 1: f32 features, batch NOT a multiple of the tile -> exercises the
    # multi-step grid, pipelining, tail-row masking, and per-tile partial sums.
    B, D = 37, 128
    feat1 = jax.random.normal(k1, (B, D), dtype=jnp.float32)
    feat2 = jax.random.normal(k2, (B, D), dtype=jnp.float32)
    label = (jax.random.uniform(k3, (B,)) > 0.5).astype(jnp.float32)

    out = contrastive_loss(feat1, feat2, label, tile_b=16)
    jax.block_until_ready(out)
    ref = contrastive_loss_ref(feat1, feat2, label)
    assert jnp.allclose(out, ref, rtol=1e-5, atol=1e-5), (out, ref)

    # Case 2: bf16 features (native dtype flows into the kernel, widened in-kernel),
    # narrow feature dim, default auto-sized (single full-extent) tile.
    B2, D2 = 8, 32
    f1b = jax.random.normal(k1, (B2, D2), dtype=jnp.float32).astype(jnp.bfloat16)
    f2b = jax.random.normal(k2, (B2, D2), dtype=jnp.float32).astype(jnp.bfloat16)
    lbl2 = (jax.random.uniform(k3, (B2,)) > 0.5).astype(jnp.float32)

    out2 = contrastive_loss(f1b, f2b, lbl2)
    jax.block_until_ready(out2)
    ref2 = contrastive_loss_ref(f1b, f2b, lbl2)
    assert jnp.allclose(out2, ref2, rtol=1e-4, atol=1e-4), (out2, ref2)

    print("KERNEL_OK")
</pallas_src>

<mosaic_0001>
module attributes {stable_mosaic.version = 11 : i64} {
  func.func @contrastive_loss_kernel(%arg0: i32, %arg1: memref<16x128xf32, #tpu.memory_space<vmem>>, %arg2: memref<16x128xf32, #tpu.memory_space<vmem>>, %arg3: memref<16x1xf32, #tpu.memory_space<vmem>>, %arg4: memref<1x8x128xf32, #tpu.memory_space<vmem>>) attributes {dimension_semantics = [#tpu.dimension_semantics<parallel>], iteration_bounds = array<i64: 3>, scalar_prefetch = 0 : i64, scratch_operands = 0 : i64, tpu.core_type = #tpu.core_type<tc>, window_params = [{transform_indices = @transform_0, window_bounds = array<i64: 16, 128>}, {transform_indices = @transform_1, window_bounds = array<i64: 16, 128>}, {transform_indices = @transform_2, window_bounds = array<i64: 16, 1>}, {transform_indices = @transform_3, window_bounds = array<i64: 1, 8, 128>}]} {
    %c0 = arith.constant 0 : index
    %c0_0 = arith.constant 0 : index
    %0 = vector.load %arg1[%c0, %c0_0] : memref<16x128xf32, #tpu.memory_space<vmem>>, vector<16x128xf32>
    %c0_1 = arith.constant 0 : index
    %c0_2 = arith.constant 0 : index
    %1 = vector.load %arg2[%c0_1, %c0_2] : memref<16x128xf32, #tpu.memory_space<vmem>>, vector<16x128xf32>
    %c0_3 = arith.constant 0 : index
    %c0_4 = arith.constant 0 : index
    %2 = vector.load %arg3[%c0_3, %c0_4] : memref<16x1xf32, #tpu.memory_space<vmem>>, vector<16x1xf32>
    %3 = arith.subf %0, %1 : vector<16x128xf32>
    %cst = arith.constant 9.99999997E-7 : f32
    %4 = vector.broadcast %cst : f32 to vector<16x128xf32>
    %5 = arith.addf %3, %4 : vector<16x128xf32>
    %6 = arith.mulf %5, %5 : vector<16x128xf32>
    %cst_5 = arith.constant dense<0.000000e+00> : vector<16xf32>
    %7 = vector.multi_reduction <add>, %6, %cst_5 [1] : vector<16x128xf32> to vector<16xf32>
    %8 = vector.shape_cast %7 : vector<16xf32> to vector<16x1xf32>
    %9 = math.sqrt %8 : vector<16x1xf32>
    %cst_6 = arith.constant 1.000000e+00 : f32
    %10 = vector.broadcast %cst_6 : f32 to vector<16x1xf32>
    %11 = arith.subf %10, %9 : vector<16x1xf32>
    %cst_7 = arith.constant 0.000000e+00 : f32
    %12 = vector.broadcast %cst_7 : f32 to vector<16x1xf32>
    %13 = arith.maximumf %11, %12 : vector<16x1xf32>
    %14 = arith.mulf %2, %8 : vector<16x1xf32>
    %cst_8 = arith.constant 1.000000e+00 : f32
    %15 = vector.broadcast %cst_8 : f32 to vector<16x1xf32>
    %16 = arith.subf %15, %2 : vector<16x1xf32>
    %17 = arith.mulf %16, %13 : vector<16x1xf32>
    %18 = arith.mulf %17, %13 : vector<16x1xf32>
    %19 = arith.addf %14, %18 : vector<16x1xf32>
    %c16_i32 = arith.constant 16 : i32
    %20 = arith.muli %arg0, %c16_i32 : i32
    %21 = tpu.iota {dimensions = array<i32: 0>} : vector<16x1xi32>
    %22 = vector.broadcast %20 : i32 to vector<16x1xi32>
    %23 = arith.addi %22, %21 : vector<16x1xi32>
    %c37_i32 = arith.constant 37 : i32
    %24 = vector.broadcast %c37_i32 : i32 to vector<16x1xi32>
    %25 = arith.cmpi slt, %23, %24 : vector<16x1xi32>
    %cst_9 = arith.constant 0.000000e+00 : f32
    %26 = vector.broadcast %cst_9 : f32 to vector<16x1xf32>
    %27 = arith.select %25, %19, %26 : vector<16x1xi1>, vector<16x1xf32>
    %cst_10 = arith.constant dense<0.000000e+00> : vector<1xf32>
    %28 = vector.multi_reduction <add>, %27, %cst_10 [0] : vector<16x1xf32> to vector<1xf32>
    %29 = vector.shape_cast %28 : vector<1xf32> to vector<1x1xf32>
    %30 = vector.shape_cast %29 : vector<1x1xf32> to vector<1x1x1xf32>
    %31 = vector.broadcast %30 : vector<1x1x1xf32> to vector<1x8x128xf32>
    %c0_11 = arith.constant 0 : index
    %c0_12 = arith.constant 0 : index
    %c0_13 = arith.constant 0 : index
    %32 = vector.load %arg4[%c0_11, %c0_12, %c0_13] : memref<1x8x128xf32, #tpu.memory_space<vmem>>, vector<1x8x128xf32>
    tpu.vector_store %arg4[%c0_11, %c0_12, %c0_13], %31 {strides = array<i32>} : memref<1x8x128xf32, #tpu.memory_space<vmem>>, vector<1x8x128xf32>,
    return
  }
  func.func @transform_0(%arg0: i32) -> (i32, i32) {
    %c0_i32 = arith.constant 0 : i32
    %c0_i32_0 = arith.constant 0 : i32
    return %arg0, %c0_i32 : i32, i32
  }
  func.func @transform_1(%arg0: i32) -> (i32, i32) {
    %c0_i32 = arith.constant 0 : i32
    %c0_i32_0 = arith.constant 0 : i32
    return %arg0, %c0_i32 : i32, i32
  }
  func.func @transform_2(%arg0: i32) -> (i32, i32) {
    %c0_i32 = arith.constant 0 : i32
    %c0_i32_0 = arith.constant 0 : i32
    return %arg0, %c0_i32 : i32, i32
  }
  func.func @transform_3(%arg0: i32) -> (i32, i32, i32) {
    %c0_i32 = arith.constant 0 : i32
    %c0_i32_0 = arith.constant 0 : i32
    %c0_i32_1 = arith.constant 0 : i32
    return %arg0, %c0_i32, %c0_i32_0 : i32, i32, i32
  }
}

</mosaic_0001>

<bundles_post_ra>
// kernel: tpu_custom_call.1
= control target key start
LH: loop header
LB: loop body
LE: loop exit
PB: predicated region body
PF: predicated region fallthrough
CT: control target
= control target key end

     0   :  { %8 = vsyncpa [#allocation3], 0  ;;  %s818_s0 = inlined_call_operand.vmem [shape: f32[37,128], index: 0, kind: input, shape index: {}]   ;;  %s819_s1 = inlined_call_operand.hbm [shape: f32[37,128], index: 1, kind: input, shape index: {}]   ;;  %s820_s2 = inlined_call_operand.vmem [shape: f32[37,1], index: 2, kind: input, shape index: {}]   ;;  %s821_s3 = inlined_call_operand.hbm [shape: f32[3,8,128], index: 3, kind: output, shape index: {}]  }
   0x1   :  { %10 = vsyncpa [#allocation3 + $0x1], 0 }
   0x2   :  { %11 = vsyncpa [#allocation4], 0 }
   0x3   :  { %13 = vsyncpa [#allocation4 + $0x1], 0  ;;  %s656_s12 = smov 0   ;;  %s658_s13 = smov 0  }
   0x4   :  { %s660_s14 = smov 0   ;;  %s662_s15 = smov 0  }
   0x5 LB: > { %s677_s16 = sadd.s32 4294967295, %s629_s15   ;;  %s463_s17 = sadd.s32 4294967294, %s629_s15   ;;  %s629_s15 = sphi %s662_s15, %s829_s15   ;;  %s625_s14 = sphi %s660_s14, %s828_s14   ;;  %s621_s13 = sphi %s658_s13, %s827_s13   ;;  %s617_s12 = sphi %s656_s12, %s826_s12  }
   0x6   : > { %s681_s18 = sadd.s32 1, %s629_s15   ;;  %s52_s19 = sadd.s32 1, %s625_s14 }
   0x7   : > { %s49_s20 = ssub.s32 %s629_s15, %s681_s18  ;;  %p59_p0 = scmp.ne.s32.totalorder %s625_s14, %s621_s13 }
   0x8   : > { %p50_p1 = scmp.eq.s32.totalorder %s49_s20, 0  ;;  %p60_p2 = scmp.eq.s32.totalorder %s629_s15, 0 }
   0x9   : > { %p65_p3 = scmp.ne.s32.totalorder %s621_s13, %s617_s12  ;;  %p66_p4 = scmp.eq.s32.totalorder %s677_s16, 0 }
   0xa   : > { %s693_s21 = scalar_select %p50_p1, %s625_s14, %s52_s19  }
   0xb   : > { %p61_p5 = por %p60_p2, %p59_p0  ;;  %p695_p6 = por %p66_p4, %p65_p3 }
   0xc   : > { %p115_p7 = scmp.eq.s32.totalorder %s677_s16, 2  ;;  %p121_p8 = scmp.eq.s32.totalorder %s463_s17, 2 }
   0xd   : > { %p465_p11 = scmp.ge.s32.totalorder %s629_s15, 3 }
   0xe   : > { %p700_p9 = por %p115_p7, %p59_p0  ;;  %p704_p10 = por %p121_p8, %p65_p3 }
   0xf   : > { %137 = sbr.rel (%p465_p11) target bundleno = 57 (0x39), region = 16 }
  0x10   : > { %s824_s24 = scalar_select %p704_p10, 1, 0 }
  0x16   : > { %157 = sbr.rel (!%p61_p5) target bundleno = 57 (0x39), region = 24  ;;  %s158_s25 = sand.u32 (%p61_p5), 1, %s625_s14  }
  0x17   : > { %s467_s26 = sshll.u32 (%p61_p5), %s629_s15, 1  ;;  %s466_s27 = sshll.u32 (%p61_p5), %s158_s25, 4 }
  0x18   : > { %s164_s28 = ssub.s32 (%p61_p5), 5, %s467_s26  ;;  %s714_s4 = scalar_lea.sflag (%p61_p5), [#allocation3], %s158_s25 }
  0x19   : > { %p165_p12 = scmp.lt.s32.totalorder (%p61_p5), %s164_s28, 2  ;;  %s162_s5 = scalar_lea.vmem (%p61_p5), [#allocation2], %s466_s27 }
  0x1d   : > { %s831_s28 = smov (!%p165_p12, %s164_s28), 2 }
  0x1e   : > { %s711_s29 = sshll.u32 %s831_s28, 7 }
  0x1f   : > { %s169_s30 = ssub.s32 256, %s711_s29 }
  0x20   : > { %170 = vsyncadd %s714_s4, %s169_s30  ;;  %p469_p13 = scmp.ne.s32.totalorder %s711_s29, 0  ;;  %s485_s6 = sshll.u32 %s629_s15, 8 }
  0x21   : > { %s722_s9 = scalar_lea.hbm %s819_s1, %s485_s6  ;;  %s175_s10 = sshll.u32 %s162_s5, 4  ;;  %s724_s10 = int_to_ptr.vmem [resolvable:$true] %s175_s10 }
  0x22   : > { %s535_s11 = scalar_lea.hbm %s722_s9, %s711_s29  ;;  %s539_s20 = scalar_lea.hbm %s819_s1, 640 }
  0x23   : > { %p536_p0 = scmp.ne.s32.totalorder %s722_s9, %s535_s11  ;;  %p540_p3 = scmp.lt.u32.totalorder %s722_s9, %s819_s1 }
  0x24   : > { %p541_p4 = scmp.lt.u32.totalorder %s539_s20, %s535_s11  ;;  %p543_p7 = scmp.lt.u32.totalorder %s535_s11, %s722_s9 }
  0x25   : > { %p537_p1 = pnand %p536_p0, %p469_p13 }
  0x26   : > { %p542_p5 = por %p541_p4, %p540_p3 }
  0x27   : > { %p538_p2 = pneg %p537_p1 }
  0x28   : > { %p544_p8 = por %p543_p7, %p542_p5 }
  0x2a   : > { %p545_p11 = pnand %p544_p8, %p538_p2 }
  0x2c   : > { %548 = shalt.err (!%p545_p11)
}
  0x2d   : > { %s549_s27 = scalar_lea.vmem %s724_s10, %s711_s29  ;;  %s631_s28 = smov [#allocation2]  }
  0x2e   : > { %p550_p12 = scmp.ne.s32.totalorder %s724_s10, %s549_s27  ;;  %s553_s30 = sshll.u32 %s631_s28, 4  ;;  %s554_s30 = int_to_ptr.vmem [resolvable:$false] %s553_s30 }
  0x2f   : > { %s555_s5 = scalar_lea.vmem %s554_s30, 512  ;;  %p556_p10 = scmp.lt.s32.totalorder %s724_s10, %s554_s30 }
  0x30   : > { %p551_p0 = pnand %p550_p12, %p469_p13  ;;  %p557_p3 = scmp.lt.s32.totalorder %s555_s5, %s549_s27 }
  0x32   : > { %p552_p1 = pneg %p551_p0  ;;  %p558_p4 = por %p557_p3, %p556_p10 }
  0x34   : > { %p559_p5 = pnand %p558_p4, %p552_p1 }
  0x36   : > { %562 = shalt.err (!%p559_p5)
}
  0x37   : > { %s632_s6 = smov 128   ;;  %s633_s7 = smov 8  }
  0x38   : > { %181 = dma.hbm_to_vmem [thread:$0]  (%p469_p13), %s722_s9, %s711_s29, %s724_s10, %s714_s4, %s632_s6, %s632_s6, %s633_s7  }
  0x39 PF: > { %p473_p2 = scmp.ge.s32.totalorder %s629_s15, 1  ;;  %p200_p7 = scmp.lt.s32.totalorder %s629_s15, 4 }
  0x3b   : > { %p201_p8 = pnand %p473_p2, %p200_p7 }
  0x3c   : > { %s754_s8 = sand.u32 (!%p201_p8), 1, %s621_s13  }
  0x3d   : > { %204 = sbr.rel (%p201_p8) target bundleno = 411 (0x19b), region = 32  ;;  %s474_s11 = sshll.u32 (!%p201_p8), %s754_s8, 4 }
  0x3e   : > { %s207_s17 = scalar_lea.sflag (!%p201_p8), [#allocation3], %s754_s8  ;;  %s210_s19 = scalar_lea.vmem (!%p201_p8), [#allocation2], %s474_s11 }
  0x44   : > { %608 = dma.done.wait (%p695_p6), %s207_s17, 256  }
  0x45   : > { %610 = vsyncadd (%p695_p6), %s207_s17, 4294967040  ;;  %s476_s29 = sshll.u32 %s677_s16, 1  ;;  %v286_v1 = vld [vmem:[%s210_s19] sm:$0xff]  ;;  %v287_v4 = vld [vmem:[%s210_s19 + $0x8] sm:$0xff]  ;;  %v634_v10 = vmov 0   ;;  %v329_v16 = vlaneseq  ;;  %s480_s27 = sshll.u32 %s677_s16, 4 }
  0x46   : > { %p256_p10 = scmp.lt.s32.totalorder %s476_s29, 4  ;;  %529 = vset.pattern.permute.xlu1 %v634_v10  ;;  %530 = vset.pattern.permute.xlu0 %v634_v10  ;;  %v332_v28 = vstv %s480_s27  ;;  %vm339_vm6 = vcmask 7168   ;;  %s475_s28 = sshll.u32 %s754_s8, 3 }
  0x47   : > { %v330_v25 = vshrl.u32 %v329_v16, 7  ;;  %s250_s30 = scalar_lea.vmem [#allocation5], %s475_s28  ;;  %s482_s6 = sshll.u32 %s677_s16, 7 }
  0x48   : > { %s833_s29 = smov (!%p256_p10, %s476_s29), 4  ;;  %s369_s5 = sshll.u32 %s250_s30, 4  ;;  %s772_s5 = int_to_ptr.vmem [resolvable:$true] %s369_s5 }
  0x49   : > { %s477_s4 = sshll.u32 %s833_s29, 3  ;;  %v331_v31 = vadd.s32 8, %v330_v25  ;;  %v333_v35 = vadd.s32 %v332_v28, %v330_v25  ;;  %s777_s17 = scalar_lea.hbm %s821_s3, %s482_s6 }
  0x4a   : > { %s259_s20 = scalar_lea.vmem %s818_s0, %s477_s4  ;;  %s278_s26 = scalar_lea.vmem %s820_s2, %s477_s4 }
  0x4b   : > { %v284_v0 = vld [vmem:[%s259_s20] sm:$0xff]  ;;  %v285_v3 = vld [vmem:[%s259_s20 + $0x8] sm:$0xff]  ;;  %v334_v39 = vadd.s32 %v332_v28, %v331_v31  ;;  %vm335_vm4 = vcmp.lt.s32.totalorder %v333_v35, 37  ;;  %s356_s19 = scalar_lea.sflag [#allocation4], %s754_s8  ;;  %s563_s29 = scalar_lea.vmem %s772_s5, 128 }
  0x4c   : > { %v290_v2 = vsub.f32 %v284_v0, %v286_v1  ;;  %v291_v5 = vsub.f32 %v285_v3, %v287_v4  ;;  %v288_v19 = vld [vmem:[%s278_s26] sm:$0xff]  ;;  %v289_v29 = vld [vmem:[%s278_s26 + $0x8] sm:$0xff]  ;;  %p564_p6 = scmp.ne.s32.totalorder %s772_s5, %s563_s29  ;;  %s635_s4 = smov [#allocation5]  }
  0x4d   : > { %v320_v21 = vsub.f32 1.0, %v288_v19  ;;  %v321_v32 = vsub.f32 1.0, %v289_v29  ;;  %vm336_vm5 = vcmp.lt.s32.totalorder %v334_v39, 37  ;;  %s567_s16 = sshll.u32 %s635_s4, 4  ;;  %s568_s16 = int_to_ptr.vmem [resolvable:$false] %s567_s16 }
  0x4e   : > { %v292_v6 = vadd.f32 1e-06, %v290_v2  ;;  %v293_v7 = vadd.f32 1e-06, %v291_v5  ;;  %p565_p13 = pnand %p564_p6, %p700_p9  ;;  %s569_s9 = scalar_lea.vmem %s568_s16, 256 }
  0x4f   : > { %p570_p12 = scmp.lt.s32.totalorder %s772_s5, %s568_s16  ;;  %p571_p0 = scmp.lt.s32.totalorder %s569_s9, %s563_s29 }
  0x50   : > { %v294_v8 = vmul.f32 %v292_v6, %v292_v6  ;;  %v295_v9 = vmul.f32 %v293_v7, %v293_v7  ;;  %p566_p11 = pneg %p565_p13 }
  0x51   : > { %p572_p1 = por %p571_p0, %p570_p12 }
  0x52   : > { %296 = vadd.xlane.f32.xlu0 %v294_v8 }
  0x53   : > { %p573_p3 = pnand %p572_p1, %p566_p11 }
  0x56   : > { %298 = vadd.xlane.f32.xlu0 %v295_v9 }
  0xdf   : > { %v297_v11 = vpop.xlane.xlu0 %296 }
  0xe0   : > { %531 = vrsqrt.f32 %v297_v11  ;;  %vm302_vm0 = vcmp.eq.f32.partialorder %v297_v11, inf  ;;  %v305_v15 = vand.u32 2147483648, %v297_v11  ;;  %vm304_vm1 = vcmp.eq.f32.partialorder %v297_v11, 0.0 }
  0xe1   : > { %v318_v37 = vmul.f32 %v297_v11, %v288_v19 }
  0xe3   : > { %v299_v12 = vpop.xlane.xlu0 %298 }
  0xe4   : > { %533 = vrsqrt.f32 %v299_v12  ;;  %vm309_vm2 = vcmp.eq.f32.partialorder %v299_v12, inf  ;;  %v312_v24 = vand.u32 2147483648, %v299_v12  ;;  %vm311_vm3 = vcmp.eq.f32.partialorder %v299_v12, 0.0 }
  0xe5   : > { %v319_v42 = vmul.f32 %v299_v12, %v289_v29 }
  0xea   : > { %v532_v13 = vpop.eup %531 }
  0xeb   : > { %v301_v14 = vmul.f32 %v532_v13, %v297_v11 }
  0xed   : > { %v303_v17 = vsel %vm302_vm0, %v297_v11, %v301_v14 }
  0xee   : > { %v534_v18 = vpop.eup %533  ;;  %v306_v20 = vsel %vm304_vm1, %v305_v15, %v303_v17 }
  0xef   : > { %v308_v22 = vmul.f32 %v534_v18, %v299_v12  ;;  %v314_v23 = vsub.f32 1.0, %v306_v20 }
  0xf1   : > { %v310_v26 = vsel %vm309_vm2, %v299_v12, %v308_v22  ;;  %v316_v27 = vmax.f32 %v314_v23, 0.0 }
  0xf2   : > { %v313_v30 = vsel %vm311_vm3, %v312_v24, %v310_v26 }
  0xf3   : > { %v315_v33 = vsub.f32 1.0, %v313_v30  ;;  %v322_v34 = vmul.f32 %v320_v21, %v316_v27 }
  0xf5   : > { %v317_v36 = vmax.f32 %v315_v33, 0.0  ;;  %v324_v38 = vmul.f32 %v322_v34, %v316_v27 }
  0xf7   : > { %v323_v40 = vmul.f32 %v321_v32, %v317_v36  ;;  %v326_v41 = vadd.f32 %v324_v38, %v318_v37 }
  0xf9   : > { %v325_v43 = vmul.f32 %v323_v40, %v317_v36  ;;  %v337_v45 = vsel %vm335_vm4, %v326_v41, 0.0 }
  0xfa   : > { %v340_v47 = vsel %vm339_vm6, %v337_v45, 0.0 }
  0xfb   : > { %v327_v44 = vadd.f32 %v325_v43, %v319_v42 }
  0xfd   : > { %v338_v46 = vsel %vm336_vm5, %v327_v44, 0.0 }
  0xfe   : > { %v341_v48 = vsel %vm339_vm6, %v338_v46, 0.0 }
  0xff   : > { %v342_v49 = vadd.f32 %v341_v48, %v340_v47 }
 0x101   : > { %v343_v50 = vrot.slane %v342_v49, 4 }
 0x103   : > { %v344_v51 = vadd.f32 %v343_v50, %v342_v49 }
 0x105   : > { %v345_v52 = vrot.slane %v344_v51, 2 }
 0x107   : > { %v346_v53 = vadd.f32 %v345_v52, %v344_v51 }
 0x109   : > { %v347_v54 = vrot.slane %v346_v53, 1 }
 0x10b   : > { %v348_v55 = vadd.f32 %v347_v54, %v346_v53 }
 0x10d   : > { %351 = vperm.xlu1 %529, %v348_v55  }
 0x18c   : > { %v352_v56 = vpop.permute.xlu1 %351 }
 0x18d   : > { %354 = vst [vmem:[%s250_s30] sm:$0xff] %v352_v56 }
 0x18e   : > { %576 = shalt.err (!%p573_p3)
}
 0x18f   : > { %s577_s8 = scalar_lea.hbm %s777_s17, 128  ;;  %s581_s22 = scalar_lea.hbm %s821_s3, 384 }
 0x190   : > { %p578_p4 = scmp.ne.s32.totalorder %s777_s17, %s577_s8  ;;  %p582_p7 = scmp.lt.u32.totalorder %s777_s17, %s821_s3 }
 0x191   : > { %p583_p8 = scmp.lt.u32.totalorder %s581_s22, %s577_s8  ;;  %p585_p6 = scmp.lt.u32.totalorder %s577_s8, %s777_s17 }
 0x192   : > { %p579_p5 = pnand %p578_p4, %p700_p9 }
 0x193   : > { %p584_p10 = por %p583_p8, %p582_p7 }
 0x194   : > { %p580_p2 = pneg %p579_p5 }
 0x195   : > { %p586_p13 = por %p585_p6, %p584_p10 }
 0x197   : > { %p587_p11 = pnand %p586_p13, %p580_p2 }
 0x199   : > { %590 = shalt.err (!%p587_p11)
}
 0x19a   : > { %487 = dma.vmem_to_hbm [thread:$0]  (%p700_p9), %s772_s5, 128, %s777_s17, %s356_s19  }
 0x19b PF: > { %p493_p12 = scmp.ge.s32.totalorder %s629_s15, 2  ;;  %s381_s27 = sand.u32 1, %s617_s12  }
 0x19c   : > { %p825_p0 = scmp.ne.s32.totalorder %s824_s24, 0  ;;  %s382_s28 = scalar_lea.sflag [#allocation4], %s381_s27 }
 0x19e   : > { %p490_p1 = pnand %p493_p12, %p825_p0 }
 0x1a0   : > { %612 = dma.done.wait (!%p490_p1), %s382_s28, 128  }
 0x1a1   : > { %614 = vsyncadd (!%p490_p1), %s382_s28, 4294967168  ;;  %p16_p3 = scmp.ge.s32.totalorder %s681_s18, 5   ;;  %s826_s12 = smov %s621_s13 }
 0x1a2   : > { %s827_s13 = smov %s625_s14  ;;  %s828_s14 = smov %s693_s21 }
 0x1a3   : > { %s829_s15 = smov %s681_s18  ;;  %18 = sbr.rel (!%p16_p3) target bundleno = 5 (0x5), region = 83 }
 0x1aa   :  { %387 = vsyncpa [#allocation3], 1 }
 0x1ab   :  { %389 = vsyncpa [#allocation3 + $0x1], 1 }
 0x1ac   :  { %390 = vsyncpa [#allocation4], 1 }
 0x1ad   :  { %392 = vsyncpa [#allocation4 + $0x1], 1 }

</bundles_post_ra>
